<compile_context>
chip_gen: v7x
topology: tpu7x:2x2x1
jax: 0.10.0
libtpu: 0.0.40
codegen_flags: <defaults>
</compile_context>

<pallas_src>
import functools

import jax
import jax.numpy as jnp
from jax import lax
from jax.experimental import pallas as pl
from jax.experimental.pallas import tpu as pltpu


def _round_up(n, m):
    return (n + m - 1) // m * m


def _attention_kernel(x_ref, w_ref, b_ref, o_ref, acc_ref, l_ref, *, s_valid):
    # x_ref: (TB, s_blk, F) VMEM block    w_ref: (1, F) VMEM
    # b_ref: (1, 1) SMEM scalar bias      o_ref: (TB, F) VMEM output block
    # acc_ref: (TB, F) f32 scratch        l_ref: (TB, 1) f32 scratch
    j = pl.program_id(1)
    s_blk = x_ref.shape[1]

    @pl.when(j == 0)
    def _init():
        acc_ref[...] = jnp.zeros_like(acc_ref)
        l_ref[...] = jnp.zeros_like(l_ref)

    x = x_ref[...].astype(jnp.float32)               # (TB, s_blk, F) block
    w = w_ref[...].astype(jnp.float32)               # (1, F)
    bias = b_ref[0, 0]

    # Score pass on the VPU. keepdims keeps the step axis on sublanes so the
    # weighted-sum pass only needs a cheap lane broadcast (no lane->sublane
    # relayout through the XLU).
    e = jnp.tanh(jnp.sum(x * w[None, :, :], axis=-1, keepdims=True) + bias)
    # tanh(.) in [-1, 1] => exp(.) is perfectly conditioned; the streamed
    # softmax needs no running-max rescaling.
    p = jnp.exp(e)                                   # (TB, s_blk, 1)

    if s_valid % s_blk != 0:
        # Ragged last step block: padded steps get zero softmax weight.
        step = j * s_blk + lax.broadcasted_iota(jnp.int32, p.shape, 1)
        p = jnp.where(step < s_valid, p, 0.0)

    l_ref[...] += jnp.sum(p, axis=1)                 # (TB, 1) softmax denom
    acc_ref[...] += jnp.sum(p * x, axis=1)           # (TB, F) weighted sum

    @pl.when(j == pl.num_programs(1) - 1)
    def _finalize():
        # Exact divide (keeps strict parity with torch's normalized softmax).
        o_ref[...] = (acc_ref[...] / l_ref[...]).astype(o_ref.dtype)


def attention_forward(x, w, b):
    """Linear attention pooling.

    x: (B, S, F)    input (batch, step_dim, feature_dim)
    w: (1, F)       nn.Linear(feature_dim, 1) weight
    b: (1,)/(1,1)   bias
    returns (B, F)
    """
    B, S, F = x.shape
    itemsize = jnp.dtype(x.dtype).itemsize

    # --- Tile plan ----------------------------------------------------------
    # Memory-bound op: aim for ~2 MiB per (double-buffered) x block so the
    # ~0.35 us grid-step overhead is amortized (>=85% of HBM roofline measured
    # at >=1-2 MiB tiles), while the working set -- 2x x block (double buffer)
    # + a few f32 block-sized temporaries + accumulators -- stays well under
    # the 32 MiB scoped-VMEM limit requested below (safe on v5e/v6e/v7x).
    F_lanes = _round_up(F, 128)          # lane padding applied by Mosaic
    S_sub = _round_up(S, 8)              # sublane padding applied by Mosaic
    target_blk_bytes = 2 * 1024 * 1024
    row_bytes = S_sub * F_lanes * itemsize            # one full batch row

    if B <= 8:
        tb = B                           # single batch block (tb == B is legal)
    else:
        tb = max(8, (target_blk_bytes // max(row_bytes, 1)) // 8 * 8)
        # Keep at least 2 batch blocks so both v7x TensorCores (and megacore on
        # v5e/v6e) get work along this "parallel" axis.
        tb = min(tb, _round_up(pl.cdiv(B, 2), 8))

    if S <= 8 or tb * row_bytes <= target_blk_bytes:
        s_blk = S                        # whole rows fit: single step block
    else:
        # Long-sequence fallback: stream over step chunks (multiple of 8) with
        # the online accumulator instead of blowing the per-block budget.
        s_blk = max(8, (target_blk_bytes // max(tb * F_lanes * itemsize, 1)) // 8 * 8)
        if s_blk >= S:
            s_blk = S

    grid = (pl.cdiv(B, tb), pl.cdiv(S, s_blk))

    w2 = jnp.asarray(w, jnp.float32).reshape(1, F)
    b2 = jnp.asarray(b, jnp.float32).reshape(1, 1)

    kernel = functools.partial(_attention_kernel, s_valid=S)

    return pl.pallas_call(
        kernel,
        out_shape=jax.ShapeDtypeStruct((B, F), x.dtype),
        grid=grid,
        in_specs=[
            # x streamed directly from HBM -- no wrapper-side padded copy.
            pl.BlockSpec((tb, s_blk, F), lambda i, j: (i, j, 0)),
            pl.BlockSpec((1, F), lambda i, j: (0, 0)),
            pl.BlockSpec((1, 1), lambda i, j: (0, 0),
                         memory_space=pltpu.MemorySpace.SMEM),
        ],
        out_specs=pl.BlockSpec((tb, F), lambda i, j: (i, 0)),
        scratch_shapes=[
            pltpu.VMEM((tb, F), jnp.float32),   # weighted-sum accumulator
            pltpu.VMEM((tb, 1), jnp.float32),   # softmax denominator
        ],
        compiler_params=pltpu.CompilerParams(
            dimension_semantics=("parallel", "arbitrary"),
            vmem_limit_bytes=32 * 1024 * 1024,
        ),
    )(x, w2, b2)


def attention_reference(x, w, b):
    eij = jnp.einsum("bsf,of->bs", x, w) + jnp.reshape(b, (-1,))[0]
    eij = jnp.tanh(eij)
    a = jax.nn.softmax(eij, axis=1)
    return jnp.sum(x * a[:, :, None], axis=1)


if __name__ == "__main__":
    B, S, F = 2, 8, 32   # batch, step_dim, feature_dim

    key = jax.random.PRNGKey(0)
    kx, kw, kb = jax.random.split(key, 3)

    x = jax.random.normal(kx, (B, S, F), dtype=jnp.float32)
    # nn.Linear(feature_dim, 1, bias=True): weight (1, F), bias (1,)
    w = jax.random.normal(kw, (1, F), dtype=jnp.float32) * 0.1
    b = jax.random.normal(kb, (1,), dtype=jnp.float32) * 0.1

    out = attention_forward(x, w, b)
    out = jax.block_until_ready(out)

    ref = attention_reference(x, w, b)
    assert out.shape == (B, F)
    assert jnp.allclose(out, ref, atol=2e-3, rtol=2e-3), "mismatch vs reference"

    print("KERNEL_OK")
</pallas_src>

<mosaic_0001>
module attributes {stable_mosaic.version = 11 : i64} {
  func.func @_attention_kernel(%arg0: i32, %arg1: i32, %arg2: memref<2x8x32xf32, #tpu.memory_space<vmem>>, %arg3: memref<1x32xf32, #tpu.memory_space<vmem>>, %arg4: memref<1x1xf32, #tpu.memory_space<smem>>, %arg5: memref<2x32xf32, #tpu.memory_space<vmem>>, %arg6: memref<2x32xf32, #tpu.memory_space<vmem>>, %arg7: memref<2x1xf32, #tpu.memory_space<vmem>>) attributes {dimension_semantics = [#tpu.dimension_semantics<parallel>, #tpu.dimension_semantics<arbitrary>], iteration_bounds = array<i64: 1, 1>, scalar_prefetch = 0 : i64, scratch_operands = 2 : i64, tpu.core_type = #tpu.core_type<tc>, window_params = [{transform_indices = @transform_0, window_bounds = array<i64: 2, 8, 32>}, {pipeline_mode = #tpu.pipeline_mode<synchronous>, transform_indices = @transform_1, window_bounds = array<i64: 1, 32>}, {transform_indices = @transform_2, window_bounds = array<i64: 1, 1>}, {transform_indices = @transform_3, window_bounds = array<i64: 2, 32>}]} {
    %c0_i32 = arith.constant 0 : i32
    %0 = arith.cmpi eq, %arg1, %c0_i32 : i32
    %1 = arith.extui %0 : i1 to i32
    %c0_i32_0 = arith.constant 0 : i32
    %2 = arith.cmpi ne, %1, %c0_i32_0 : i32
    scf.if %2 {
      %cst_19 = arith.constant 0.000000e+00 : f32
      %28 = vector.broadcast %cst_19 : f32 to vector<2x32xf32>
      %c0_20 = arith.constant 0 : index
      %c0_21 = arith.constant 0 : index
      %29 = vector.load %arg6[%c0_20, %c0_21] : memref<2x32xf32, #tpu.memory_space<vmem>>, vector<2x32xf32>
      tpu.vector_store %arg6[%c0_20, %c0_21], %28 {strides = array<i32>} : memref<2x32xf32, #tpu.memory_space<vmem>>, vector<2x32xf32>,
      %cst_22 = arith.constant 0.000000e+00 : f32
      %30 = vector.broadcast %cst_22 : f32 to vector<2x1xf32>
      %c0_23 = arith.constant 0 : index
      %c0_24 = arith.constant 0 : index
      %31 = vector.load %arg7[%c0_23, %c0_24] : memref<2x1xf32, #tpu.memory_space<vmem>>, vector<2x1xf32>
      tpu.vector_store %arg7[%c0_23, %c0_24], %30 {strides = array<i32>} : memref<2x1xf32, #tpu.memory_space<vmem>>, vector<2x1xf32>,
    } else {
    }
    %c0 = arith.constant 0 : index
    %c0_1 = arith.constant 0 : index
    %c0_2 = arith.constant 0 : index
    %3 = vector.load %arg2[%c0, %c0_1, %c0_2] : memref<2x8x32xf32, #tpu.memory_space<vmem>>, vector<2x8x32xf32>
    %c0_3 = arith.constant 0 : index
    %c0_4 = arith.constant 0 : index
    %4 = vector.load %arg3[%c0_3, %c0_4] : memref<1x32xf32, #tpu.memory_space<vmem>>, vector<1x32xf32>
    %c0_5 = arith.constant 0 : index
    %c0_6 = arith.constant 0 : index
    %5 = memref.load %arg4[%c0_5, %c0_6] : memref<1x1xf32, #tpu.memory_space<smem>>
    %6 = vector.shape_cast %4 : vector<1x32xf32> to vector<1x1x32xf32>
    %7 = vector.broadcast %6 : vector<1x1x32xf32> to vector<2x8x32xf32>
    %8 = arith.mulf %3, %7 : vector<2x8x32xf32>
    %cst = arith.constant dense<0.000000e+00> : vector<2x8xf32>
    %9 = vector.multi_reduction <add>, %8, %cst [2] : vector<2x8x32xf32> to vector<2x8xf32>
    %10 = vector.shape_cast %9 : vector<2x8xf32> to vector<2x8x1xf32>
    %11 = vector.broadcast %5 : f32 to vector<2x8x1xf32>
    %12 = arith.addf %10, %11 : vector<2x8x1xf32>
    %13 = math.tanh %12 : vector<2x8x1xf32>
    %14 = math.exp %13 : vector<2x8x1xf32>
    %c0_7 = arith.constant 0 : index
    %c0_8 = arith.constant 0 : index
    %15 = vector.load %arg7[%c0_7, %c0_8] : memref<2x1xf32, #tpu.memory_space<vmem>>, vector<2x1xf32>
    %cst_9 = arith.constant dense<0.000000e+00> : vector<2x1xf32>
    %16 = vector.multi_reduction <add>, %14, %cst_9 [1] : vector<2x8x1xf32> to vector<2x1xf32>
    %17 = arith.addf %15, %16 : vector<2x1xf32>
    %c0_10 = arith.constant 0 : index
    %c0_11 = arith.constant 0 : index
    %18 = vector.load %arg7[%c0_10, %c0_11] : memref<2x1xf32, #tpu.memory_space<vmem>>, vector<2x1xf32>
    tpu.vector_store %arg7[%c0_10, %c0_11], %17 {strides = array<i32>} : memref<2x1xf32, #tpu.memory_space<vmem>>, vector<2x1xf32>,
    %c0_12 = arith.constant 0 : index
    %c0_13 = arith.constant 0 : index
    %19 = vector.load %arg6[%c0_12, %c0_13] : memref<2x32xf32, #tpu.memory_space<vmem>>, vector<2x32xf32>
    %20 = vector.broadcast %14 : vector<2x8x1xf32> to vector<2x8x32xf32>
    %21 = arith.mulf %20, %3 : vector<2x8x32xf32>
    %cst_14 = arith.constant dense<0.000000e+00> : vector<2x32xf32>
    %22 = vector.multi_reduction <add>, %21, %cst_14 [1] : vector<2x8x32xf32> to vector<2x32xf32>
    %23 = arith.addf %19, %22 : vector<2x32xf32>
    %c0_15 = arith.constant 0 : index
    %c0_16 = arith.constant 0 : index
    %24 = vector.load %arg6[%c0_15, %c0_16] : memref<2x32xf32, #tpu.memory_space<vmem>>, vector<2x32xf32>
    tpu.vector_store %arg6[%c0_15, %c0_16], %23 {strides = array<i32>} : memref<2x32xf32, #tpu.memory_space<vmem>>, vector<2x32xf32>,
    %c0_i32_17 = arith.constant 0 : i32
    %25 = arith.cmpi eq, %arg1, %c0_i32_17 : i32
    %26 = arith.extui %25 : i1 to i32
    %c0_i32_18 = arith.constant 0 : i32
    %27 = arith.cmpi ne, %26, %c0_i32_18 : i32
    scf.if %27 {
      %c0_19 = arith.constant 0 : index
      %c0_20 = arith.constant 0 : index
      %28 = vector.load %arg6[%c0_19, %c0_20] : memref<2x32xf32, #tpu.memory_space<vmem>>, vector<2x32xf32>
      %c0_21 = arith.constant 0 : index
      %c0_22 = arith.constant 0 : index
      %29 = vector.load %arg7[%c0_21, %c0_22] : memref<2x1xf32, #tpu.memory_space<vmem>>, vector<2x1xf32>
      %30 = vector.broadcast %29 : vector<2x1xf32> to vector<2x32xf32>
      %31 = arith.divf %28, %30 : vector<2x32xf32>
      %c0_23 = arith.constant 0 : index
      %c0_24 = arith.constant 0 : index
      %32 = vector.load %arg5[%c0_23, %c0_24] : memref<2x32xf32, #tpu.memory_space<vmem>>, vector<2x32xf32>
      tpu.vector_store %arg5[%c0_23, %c0_24], %31 {strides = array<i32>} : memref<2x32xf32, #tpu.memory_space<vmem>>, vector<2x32xf32>,
    } else {
    }
    return
  }
  func.func @transform_0(%arg0: i32, %arg1: i32) -> (i32, i32, i32) {
    %c0_i32 = arith.constant 0 : i32
    %c0_i32_0 = arith.constant 0 : i32
    return %arg0, %arg1, %c0_i32 : i32, i32, i32
  }
  func.func @transform_1(%arg0: i32, %arg1: i32) -> (i32, i32) {
    %c0_i32 = arith.constant 0 : i32
    %c0_i32_0 = arith.constant 0 : i32
    %c0_i32_1 = arith.constant 0 : i32
    return %c0_i32, %c0_i32_0 : i32, i32
  }
  func.func @transform_2(%arg0: i32, %arg1: i32) -> (i32, i32) {
    %c0_i32 = arith.constant 0 : i32
    %c0_i32_0 = arith.constant 0 : i32
    %c0_i32_1 = arith.constant 0 : i32
    return %c0_i32, %c0_i32_0 : i32, i32
  }
  func.func @transform_3(%arg0: i32, %arg1: i32) -> (i32, i32) {
    %c0_i32 = arith.constant 0 : i32
    %c0_i32_0 = arith.constant 0 : i32
    return %arg0, %c0_i32 : i32, i32
  }
}

</mosaic_0001>

<bundles_post_ra>
// kernel: tpu_custom_call.1
= control target key start
LH: loop header
LB: loop body
LE: loop exit
PB: predicated region body
PF: predicated region fallthrough
CT: control target
= control target key end

     0   :  { %9 = vsyncpa [#allocation6], 0  ;;  %s271_s0 = inlined_call_operand.hbm [shape: f32[2,8,32], index: 0, kind: input, shape index: {}]   ;;  %s272_s1 = inlined_call_operand.vmem [shape: f32[1,32], index: 1, kind: input, shape index: {}]   ;;  %s273_s2 = inlined_call_operand.<no memory space> [shape: f32[1,1], index: 2, kind: input, shape index: {}]   ;;  %s274_s3 = inlined_call_operand.hbm [shape: f32[2,32], index: 3, kind: output, shape index: {}]  }
   0x1   :  { %10 = vsyncpa [#allocation7], 0  ;;  %s206_s12 = smov [#allocation5]   ;;  %s158_s16 = scalar_lea.hbm %s271_s0, 256 }
   0x2   :  { %s16_s13 = sshll.u32 %s206_s12, 4  ;;  %p159_p0 = scmp.ne.s32.totalorder %s271_s0, %s158_s16  ;;  %s17_s13 = int_to_ptr.vmem [resolvable:$true] %s16_s13 }
   0x3   :  { %p162_p1 = scmp.lt.u32.totalorder %s158_s16, %s271_s0 }
   0x5   :  { %p164_p2 = pnand %p162_p1, %p159_p0 }
   0x7   :  { %167 = shalt.err (!%p164_p2)
}
   0x8   :  { %s168_s21 = scalar_lea.vmem %s17_s13, 256  ;;  %p173_p4 = scmp.lt.s32.totalorder %s17_s13, %s17_s13 }
   0x9   :  { %p169_p3 = scmp.ne.s32.totalorder %s17_s13, %s168_s21  ;;  %p174_p5 = scmp.lt.s32.totalorder %s168_s21, %s168_s21 }
   0xb   :  { %p175_p6 = por %p174_p5, %p173_p4 }
   0xd   :  { %p176_p7 = pnand %p175_p6, %p169_p3 }
   0xf   :  { %179 = shalt.err (!%p176_p7)
}
  0x10   :  { %s207_s22 = smov 128   ;;  %s208_s23 = smov 8  }
  0x11   :  { %22 = dma.hbm_to_vmem [thread:$0]  %s271_s0, 256, %s17_s13, [#allocation6], %s207_s22, %s207_s22, %s208_s23  }
  0x12   :  { %202 = dma.done.wait [#allocation6], 256  }
  0x13   :  { %203 = vsyncadd [#allocation6], 4294967040  ;;  %vm36_vm0 = vcmask 1024   ;;  %v209_v0 = vmov 0.0   ;;  %v38_v1 = vld [vmem:[#allocation5] sm:$0xff]  ;;  %vm50_vm1 = vcmask 261120   ;;  %v57_v9 = vstv %s273_s2 }
  0x14   :  { %37 = vst.msk [vmem:[#allocation3] sm:$0x3] %vm36_vm0, %v209_v0  ;;  %v139_v2 = vld [vmem:[%s272_s1] ss:$0 sm:$0xff]  ;;  %v39_v3 = vld [vmem:[#allocation5 + $0x8] sm:$0xff]  ;;  %vm34_vm2 = vcmask 254976  }
  0x15   :  { %v48_v4 = vmul.f32 %v139_v2, %v38_v1  ;;  %v49_v5 = vmul.f32 %v139_v2, %v39_v3  ;;  %35 = vst.msk [vmem:[#allocation2] sm:$0x3] %vm34_vm2, %v209_v0  ;;  %v210_v8 = vmov 0   ;;  %vm81_vm3 = vcmask 1041409   ;;  %s211_s1 = smov [#allocation8]  }
  0x16   :  { %146 = vset.pattern.permute.xlu1 %v210_v8  ;;  %147 = vset.pattern.permute.xlu0 %v210_v8  ;;  %s130_s2 = sshll.u32 %s211_s1, 4  ;;  %s131_s2 = int_to_ptr.vmem [resolvable:$true] %s130_s2 }
  0x17   :  { %v51_v6 = vsel %vm50_vm1, %v48_v4, 0.0  ;;  %v54_v7 = vsel %vm50_vm1, %v49_v5, 0.0  ;;  %s180_s29 = scalar_lea.vmem %s131_s2, 32  ;;  %p185_p9 = scmp.lt.s32.totalorder %s131_s2, %s131_s2 }
  0x18   :  { %52 = vadd.xlane.f32.xlu0 %v51_v6  ;;  %p181_p8 = scmp.ne.s32.totalorder %s131_s2, %s180_s29  ;;  %p186_p10 = scmp.lt.s32.totalorder %s180_s29, %s180_s29 }
  0x1a   :  { %p187_p11 = por %p186_p10, %p185_p9 }
  0x1b   :  { %v66_v44 = vld [vmem:[#allocation3] sm:$0x3] }
  0x1c   :  { %55 = vadd.xlane.f32.xlu0 %v54_v7  ;;  %v87_v49 = vld [vmem:[#allocation2] sm:$0x3]  ;;  %p188_p12 = pnand %p187_p11, %p181_p8 }
  0xa5   :  { %v53_v10 = vpop.xlane.xlu0 %52 }
  0xa6   :  { %v58_v11 = vadd.f32 %v57_v9, %v53_v10 }
  0xa8   :  { %148 = vtanh.f32 %v58_v11 }
  0xa9   :  { %v56_v12 = vpop.xlane.xlu0 %55 }
  0xaa   :  { %v59_v13 = vadd.f32 %v57_v9, %v56_v12 }
  0xac   :  { %150 = vtanh.f32 %v59_v13 }
  0xb2   :  { %v149_v14 = vpop.eup %148 }
  0xb3   :  { %v62_v15 = vmul.f32 1.442695, %v149_v14 }
  0xb5   :  { %152 = vpow2.f32 %v62_v15 }
  0xb6   :  { %v151_v16 = vpop.eup %150 }
  0xb7   :  { %v64_v17 = vmul.f32 1.442695, %v151_v16 }
  0xb9   :  { %154 = vpow2.f32 %v64_v17 }
  0xbf   :  { %v153_v18 = vpop.eup %152 }
  0xc0   :  { %v67_v19 = vrot.slane %v153_v18, 4  ;;  %v88_v20 = vmul.f32 %v153_v18, %v38_v1 }
  0xc2   :  { %v68_v21 = vadd.f32 %v153_v18, %v67_v19  ;;  %v90_v22 = vsel %vm50_vm1, %v88_v20, 0.0 }
  0xc3   :  { %v155_v23 = vpop.eup %154  ;;  %v91_v24 = vrot.slane %v90_v22, 4 }
  0xc4   :  { %v69_v25 = vrot.slane %v68_v21, 2  ;;  %v73_v26 = vrot.slane %v155_v23, 4  ;;  %v89_v27 = vmul.f32 %v155_v23, %v39_v3 }
  0xc5   :  { %v92_v28 = vadd.f32 %v91_v24, %v90_v22 }
  0xc6   :  { %v70_v29 = vadd.f32 %v69_v25, %v68_v21  ;;  %v74_v30 = vadd.f32 %v155_v23, %v73_v26  ;;  %v97_v31 = vsel %vm50_vm1, %v89_v27, 0.0 }
  0xc7   :  { %v93_v32 = vrot.slane %v92_v28, 2  ;;  %v98_v33 = vrot.slane %v97_v31, 4 }
  0xc8   :  { %v75_v34 = vrot.slane %v74_v30, 2  ;;  %v71_v37 = vrot.slane %v70_v29, 1 }
  0xc9   :  { %v94_v35 = vadd.f32 %v93_v32, %v92_v28  ;;  %v99_v36 = vadd.f32 %v98_v33, %v97_v31 }
  0xca   :  { %v76_v38 = vadd.f32 %v75_v34, %v74_v30  ;;  %v72_v43 = vadd.f32 %v71_v37, %v70_v29 }
  0xcb   :  { %v100_v39 = vrot.slane %v99_v36, 2  ;;  %v95_v41 = vrot.slane %v94_v35, 1 }
  0xcc   :  { %v77_v40 = vrot.slane %v76_v38, 1 }
  0xcd   :  { %v101_v42 = vadd.f32 %v100_v39, %v99_v36  ;;  %v96_v50 = vadd.f32 %v95_v41, %v94_v35 }
  0xce   :  { %v78_v45 = vadd.f32 %v77_v40, %v76_v38 }
  0xcf   :  { %v102_v46 = vrot.slane %v101_v42, 1 }
  0xd0   :  { %v82_v47 = vsel %vm81_vm3, %v78_v45, %v72_v43 }
  0xd1   :  { %v84_v48 = vadd.f32 %v82_v47, %v66_v44  ;;  %v103_v51 = vadd.f32 %v102_v46, %v101_v42 }
  0xd3   :  { %86 = vst.msk [vmem:[#allocation3] sm:$0x3] %vm36_vm0, %v84_v48  ;;  %v106_v52 = vsel %vm81_vm3, %v103_v51, %v96_v50 }
  0xd4   :  { %v108_v53 = vadd.f32 %v106_v52, %v87_v49 }
  0xd6   :  { %110 = vst.msk [vmem:[#allocation2] sm:$0x3] %vm34_vm2, %v108_v53 }
  0xda   :  { %v115_v54 = vld [vmem:[#allocation3] sm:$0x3] }
  0xdb   :  { %118 = vperm.xlu1 %146, %v115_v54  }
  0xdd   :  { %v114_v57 = vld [vmem:[#allocation2] sm:$0x3] }
 0x15a   :  { %v119_v55 = vpop.permute.xlu1 %118 }
 0x15b   :  { %156 = vrcp.f32 %v119_v55 }
 0x165   :  { %v157_v56 = vpop.eup %156 }
 0x166   :  { %v122_v58 = vmul.f32 %v157_v56, %v114_v57 }
 0x168   :  { %123 = vst.msk [vmem:[#allocation8] sm:$0x3] %vm34_vm2, %v122_v58 }
 0x169   :  { %191 = shalt.err (!%p188_p12)
}
 0x16a   :  { %s192_s5 = scalar_lea.hbm %s274_s3, 32 }
 0x16b   :  { %p193_p13 = scmp.ne.s32.totalorder %s274_s3, %s192_s5  ;;  %p196_p0 = scmp.lt.u32.totalorder %s192_s5, %s274_s3 }
 0x16d   :  { %p198_p1 = pnand %p196_p0, %p193_p13 }
 0x16f   :  { %201 = shalt.err (!%p198_p1)
}
 0x170   :  { %133 = dma.vmem_to_hbm [thread:$0]  %s131_s2, 32, %s274_s3, [#allocation7]  }
 0x171   :  { %204 = dma.done.wait [#allocation7], 32  }
 0x172   :  { %205 = vsyncadd [#allocation7], 4294967264 }
 0x173   :  { %137 = vsyncpa [#allocation6], 1 }
 0x174   :  { %138 = vsyncpa [#allocation7], 1 }

</bundles_post_ra>
